<compile_context>
chip_gen: v7x
topology: tpu7x:2x2x1
jax: 0.10.0
libtpu: 0.0.40
codegen_flags: <defaults>
</compile_context>

<pallas_src>
import jax
import jax.numpy as jnp
from jax.experimental import pallas as pl
from jax.experimental.pallas import tpu as pltpu

H1 = 256
H2 = 128


def _round_up(n, m):
    return ((n + m - 1) // m) * m


def _mlp_kernel(x_ref, w1_ref, b1_ref, w2_ref, b2_ref, w3_ref, b3_ref, o_ref):
    # x is DMA'd as f32 (single HBM pass); cast to bf16 on the VPU for the MXU.
    x_bf = x_ref[...].astype(jnp.bfloat16)

    # Layer 1: (tile_b, D)bf16 @ (D, 256)bf16 -> f32 accumulate, bias + ReLU in f32.
    h1 = jnp.dot(x_bf, w1_ref[...], preferred_element_type=jnp.float32)
    h1 = jnp.maximum(h1 + b1_ref[...], 0.0)

    # Dropout(0.3): identity in eval mode.

    # Layer 2: (tile_b, 256)bf16 @ (256, 128)bf16 -> f32 accumulate, bias + ReLU in f32.
    h2 = jnp.dot(h1.astype(jnp.bfloat16), w2_ref[...],
                 preferred_element_type=jnp.float32)
    h2 = jnp.maximum(h2 + b2_ref[...], 0.0)

    # Layer 3: 128 -> 1.  VPU multiply + lane reduction (XLU) instead of an N=1 MXU pass.
    out = jnp.sum(h2 * w3_ref[...], axis=-1, keepdims=True) + b3_ref[...]
    o_ref[...] = out.astype(o_ref.dtype)


def _vmem_footprint_bytes(tile_b, d):
    """Rough per-tile VMEM footprint: double-buffered f32 x, bf16 casts, h1/h2, output, weights."""
    x_dbl = 2 * tile_b * d * 4          # double-buffered f32 x tile
    x_cast = tile_b * d * 2             # in-kernel bf16 copy of x
    h = tile_b * (H1 * (4 + 2) + H2 * 4)  # h1 f32+bf16, h2 f32
    out = 2 * tile_b * 1 * 4            # double-buffered output tile
    w = d * H1 * 2 + H1 * H2 * 2 + (H1 + H2 + H2 + 1) * 4
    return x_dbl + x_cast + h + out + w


def _pick_tile_b(requested, batch, d):
    """Clamp the batch tile to the batch size and to a conservative VMEM budget."""
    tile_b = max(8, _round_up(min(requested, _round_up(batch, 8)), 8))
    budget = 14 * 1024 * 1024  # stay under v5e's 16 MiB scoped default (and v7x's 32 MiB)
    while tile_b > 8 and _vmem_footprint_bytes(tile_b, d) > budget:
        tile_b = max(8, _round_up(tile_b // 2, 8))
    return tile_b


def prepare_params(params):
    """One-time (outside the hot path) parameter prep: bf16 MXU weights, f32 VPU params."""
    w1, b1, w2, b2, w3, b3 = params
    return (w1.astype(jnp.bfloat16),
            b1.reshape(1, H1).astype(jnp.float32),
            w2.astype(jnp.bfloat16),
            b2.reshape(1, H2).astype(jnp.float32),
            w3.reshape(1, H2).astype(jnp.float32),   # (1, 128) row for the lane reduce
            b3.reshape(1, 1).astype(jnp.float32))


def cvbert_regressor_forward(x, prepared_params, *, tile_b=1024):
    """Fused 3-layer MLP forward.  x: (B, input_dim) float32 -> (B, 1) float32."""
    w1_bf, b1, w2_bf, b2, w3_row, b3_sc = prepared_params
    B, D = x.shape

    tile_b = _pick_tile_b(tile_b, B, D)
    num_tiles = pl.cdiv(B, tile_b)   # partial last block is masked by Pallas; no jnp.pad

    # Advisory cost hint for XLA scheduling around the custom call.
    flops = 2 * B * (D * H1 + H1 * H2 + H2)
    bytes_accessed = (x.size * 4                      # x read once as f32
                      + w1_bf.size * 2 + w2_bf.size * 2
                      + (b1.size + b2.size + w3_row.size + b3_sc.size) * 4
                      + B * 4)                        # output
    cost = pl.CostEstimate(flops=flops, transcendentals=0,
                           bytes_accessed=bytes_accessed)

    def resident(a):
        # Weight/bias block index is constant across the grid -> DMA'd once, stays in VMEM.
        return pl.BlockSpec(a.shape, lambda i: (0, 0))

    out = pl.pallas_call(
        _mlp_kernel,
        out_shape=jax.ShapeDtypeStruct((B, 1), jnp.float32),
        grid=(num_tiles,),
        in_specs=[
            # x streams one batch tile per grid step (double-buffered by the pipeline).
            pl.BlockSpec((tile_b, D), lambda i: (i, 0)),
            resident(w1_bf), resident(b1),
            resident(w2_bf), resident(b2),
            resident(w3_row), resident(b3_sc),
        ],
        out_specs=pl.BlockSpec((tile_b, 1), lambda i: (i, 0)),
        compiler_params=pltpu.CompilerParams(
            dimension_semantics=("parallel",)),   # megacore sharding on v7x
        cost_estimate=cost,
    )(x, w1_bf, b1, w2_bf, b2, w3_row, b3_sc)

    return out


def init_params(key, input_dim):
    """Deterministic init mimicking PyTorch nn.Linear default (uniform +-1/sqrt(fan_in)).

    Weights are stored as (in_features, out_features)."""
    dims = [(input_dim, H1), (H1, H2), (H2, 1)]
    params = []
    for (fan_in, fan_out) in dims:
        key, kw, kb = jax.random.split(key, 3)
        bound = 1.0 / jnp.sqrt(jnp.float32(fan_in))
        w = jax.random.uniform(kw, (fan_in, fan_out), jnp.float32, -bound, bound)
        b = jax.random.uniform(kb, (1, fan_out), jnp.float32, -bound, bound)
        params.extend([w, b])
    return tuple(params)


def reference_forward_matched(x, params):
    """Pure-JAX reference with the same bf16-matmul / f32-accumulate numerics as the kernel."""
    w1, b1, w2, b2, w3, b3 = params
    xb, w1b, w2b = (a.astype(jnp.bfloat16) for a in (x, w1, w2))
    h1 = jnp.maximum(jnp.dot(xb, w1b, preferred_element_type=jnp.float32) + b1, 0.0)
    h2 = jnp.maximum(jnp.dot(h1.astype(jnp.bfloat16), w2b,
                             preferred_element_type=jnp.float32) + b2, 0.0)
    return jnp.sum(h2 * w3.reshape(1, -1), axis=-1, keepdims=True) + b3.reshape(1, 1)


def reference_forward_f32(x, params):
    """Pure-f32 reference matching the PyTorch module exactly (eval mode)."""
    w1, b1, w2, b2, w3, b3 = params
    h1 = jnp.maximum(x @ w1 + b1, 0.0)
    h2 = jnp.maximum(h1 @ w2 + b2, 0.0)
    return h2 @ w3 + b3


if __name__ == "__main__":
    key = jax.random.PRNGKey(0)
    k_params, k_x = jax.random.split(key)

    batch = 200
    input_dim = 64  # small "BERT embedding"-style feature dim for the smoke test

    params = init_params(k_params, input_dim)
    prepared = prepare_params(params)
    x = jax.random.normal(k_x, (batch, input_dim), jnp.float32)

    # Default path: single tile covering the whole (small) batch.
    y = jax.block_until_ready(cvbert_regressor_forward(x, prepared))
    assert y.shape == (batch, 1), y.shape

    # Partial-last-block path (B not a multiple of tile_b; Pallas masks the tail writeback).
    y_partial = jax.block_until_ready(
        cvbert_regressor_forward(x, prepared, tile_b=128))
    assert y_partial.shape == (batch, 1), y_partial.shape

    # Tight check against a reference with identical bf16/f32 numerics.
    y_ref = reference_forward_matched(x, params)
    assert jnp.allclose(y, y_ref, atol=2e-3, rtol=2e-3), "mismatch vs matched reference"
    assert jnp.allclose(y_partial, y_ref, atol=2e-3, rtol=2e-3), \
        "partial-block path mismatch vs matched reference"

    # Loose check against the exact-f32 module semantics (bf16 matmul error budget).
    y_f32 = reference_forward_f32(x, params)
    assert jnp.allclose(y, y_f32, atol=5e-2, rtol=5e-2), "mismatch vs f32 reference"

    print("KERNEL_OK")
</pallas_src>

<mosaic_0001>
module attributes {stable_mosaic.version = 11 : i64} {
  func.func @_mlp_kernel(%arg0: i32, %arg1: memref<200x64xf32, #tpu.memory_space<vmem>>, %arg2: memref<64x256xbf16, #tpu.memory_space<vmem>>, %arg3: memref<1x256xf32, #tpu.memory_space<vmem>>, %arg4: memref<256x128xbf16, #tpu.memory_space<vmem>>, %arg5: memref<1x128xf32, #tpu.memory_space<vmem>>, %arg6: memref<1x128xf32, #tpu.memory_space<vmem>>, %arg7: memref<1x1xf32, #tpu.memory_space<vmem>>, %arg8: memref<200x1xf32, #tpu.memory_space<vmem>>) attributes {dimension_semantics = [#tpu.dimension_semantics<parallel>], iteration_bounds = array<i64: 1>, scalar_prefetch = 0 : i64, scratch_operands = 0 : i64, tpu.core_type = #tpu.core_type<tc>, window_params = [{transform_indices = @transform_0, window_bounds = array<i64: 200, 64>}, {pipeline_mode = #tpu.pipeline_mode<synchronous>, transform_indices = @transform_1, window_bounds = array<i64: 64, 256>}, {pipeline_mode = #tpu.pipeline_mode<synchronous>, transform_indices = @transform_2, window_bounds = array<i64: 1, 256>}, {pipeline_mode = #tpu.pipeline_mode<synchronous>, transform_indices = @transform_3, window_bounds = array<i64: 256, 128>}, {pipeline_mode = #tpu.pipeline_mode<synchronous>, transform_indices = @transform_4, window_bounds = array<i64: 1, 128>}, {pipeline_mode = #tpu.pipeline_mode<synchronous>, transform_indices = @transform_5, window_bounds = array<i64: 1, 128>}, {pipeline_mode = #tpu.pipeline_mode<synchronous>, transform_indices = @transform_6, window_bounds = array<i64: 1, 1>}, {transform_indices = @transform_7, window_bounds = array<i64: 200, 1>}]} {
    %c0 = arith.constant 0 : index
    %c0_0 = arith.constant 0 : index
    %0 = vector.load %arg1[%c0, %c0_0] : memref<200x64xf32, #tpu.memory_space<vmem>>, vector<200x64xf32>
    %1 = arith.truncf %0 : vector<200x64xf32> to vector<200x64xbf16>
    %c0_1 = arith.constant 0 : index
    %c0_2 = arith.constant 0 : index
    %2 = vector.load %arg2[%c0_1, %c0_2] : memref<64x256xbf16, #tpu.memory_space<vmem>>, vector<64x256xbf16>
    %cst = arith.constant dense<0.000000e+00> : vector<200x256xf32>
    %3 = tpu.matmul %1, %2, %cst {dimension_numbers = #tpu.dot_dimension_numbers<[1], [0], [0], [1], [0, 0, 1, 1], [], []>} : vector<200x64xbf16>, vector<64x256xbf16>, vector<200x256xf32> -> vector<200x256xf32>
    %c0_3 = arith.constant 0 : index
    %c0_4 = arith.constant 0 : index
    %4 = vector.load %arg3[%c0_3, %c0_4] : memref<1x256xf32, #tpu.memory_space<vmem>>, vector<1x256xf32>
    %5 = vector.broadcast %4 : vector<1x256xf32> to vector<200x256xf32>
    %6 = arith.addf %3, %5 : vector<200x256xf32>
    %cst_5 = arith.constant 0.000000e+00 : f32
    %7 = vector.broadcast %cst_5 : f32 to vector<200x256xf32>
    %8 = arith.maximumf %6, %7 : vector<200x256xf32>
    %9 = arith.truncf %8 : vector<200x256xf32> to vector<200x256xbf16>
    %c0_6 = arith.constant 0 : index
    %c0_7 = arith.constant 0 : index
    %10 = vector.load %arg4[%c0_6, %c0_7] : memref<256x128xbf16, #tpu.memory_space<vmem>>, vector<256x128xbf16>
    %cst_8 = arith.constant dense<0.000000e+00> : vector<200x128xf32>
    %11 = tpu.matmul %9, %10, %cst_8 {dimension_numbers = #tpu.dot_dimension_numbers<[1], [0], [0], [1], [0, 0, 1, 1], [], []>} : vector<200x256xbf16>, vector<256x128xbf16>, vector<200x128xf32> -> vector<200x128xf32>
    %c0_9 = arith.constant 0 : index
    %c0_10 = arith.constant 0 : index
    %12 = vector.load %arg5[%c0_9, %c0_10] : memref<1x128xf32, #tpu.memory_space<vmem>>, vector<1x128xf32>
    %13 = vector.broadcast %12 : vector<1x128xf32> to vector<200x128xf32>
    %14 = arith.addf %11, %13 : vector<200x128xf32>
    %cst_11 = arith.constant 0.000000e+00 : f32
    %15 = vector.broadcast %cst_11 : f32 to vector<200x128xf32>
    %16 = arith.maximumf %14, %15 : vector<200x128xf32>
    %c0_12 = arith.constant 0 : index
    %c0_13 = arith.constant 0 : index
    %17 = vector.load %arg6[%c0_12, %c0_13] : memref<1x128xf32, #tpu.memory_space<vmem>>, vector<1x128xf32>
    %18 = vector.broadcast %17 : vector<1x128xf32> to vector<200x128xf32>
    %19 = arith.mulf %16, %18 : vector<200x128xf32>
    %cst_14 = arith.constant dense<0.000000e+00> : vector<200xf32>
    %20 = vector.multi_reduction <add>, %19, %cst_14 [1] : vector<200x128xf32> to vector<200xf32>
    %21 = vector.shape_cast %20 : vector<200xf32> to vector<200x1xf32>
    %c0_15 = arith.constant 0 : index
    %c0_16 = arith.constant 0 : index
    %22 = vector.load %arg7[%c0_15, %c0_16] : memref<1x1xf32, #tpu.memory_space<vmem>>, vector<1x1xf32>
    %23 = vector.broadcast %22 : vector<1x1xf32> to vector<200x1xf32>
    %24 = arith.addf %21, %23 : vector<200x1xf32>
    %c0_17 = arith.constant 0 : index
    %c0_18 = arith.constant 0 : index
    %25 = vector.load %arg8[%c0_17, %c0_18] : memref<200x1xf32, #tpu.memory_space<vmem>>, vector<200x1xf32>
    tpu.vector_store %arg8[%c0_17, %c0_18], %24 {strides = array<i32>} : memref<200x1xf32, #tpu.memory_space<vmem>>, vector<200x1xf32>,
    return
  }
  func.func @transform_0(%arg0: i32) -> (i32, i32) {
    %c0_i32 = arith.constant 0 : i32
    %c0_i32_0 = arith.constant 0 : i32
    return %arg0, %c0_i32 : i32, i32
  }
  func.func @transform_1(%arg0: i32) -> (i32, i32) {
    %c0_i32 = arith.constant 0 : i32
    %c0_i32_0 = arith.constant 0 : i32
    %c0_i32_1 = arith.constant 0 : i32
    return %c0_i32, %c0_i32_0 : i32, i32
  }
  func.func @transform_2(%arg0: i32) -> (i32, i32) {
    %c0_i32 = arith.constant 0 : i32
    %c0_i32_0 = arith.constant 0 : i32
    %c0_i32_1 = arith.constant 0 : i32
    return %c0_i32, %c0_i32_0 : i32, i32
  }
  func.func @transform_3(%arg0: i32) -> (i32, i32) {
    %c0_i32 = arith.constant 0 : i32
    %c0_i32_0 = arith.constant 0 : i32
    %c0_i32_1 = arith.constant 0 : i32
    return %c0_i32, %c0_i32_0 : i32, i32
  }
  func.func @transform_4(%arg0: i32) -> (i32, i32) {
    %c0_i32 = arith.constant 0 : i32
    %c0_i32_0 = arith.constant 0 : i32
    %c0_i32_1 = arith.constant 0 : i32
    return %c0_i32, %c0_i32_0 : i32, i32
  }
  func.func @transform_5(%arg0: i32) -> (i32, i32) {
    %c0_i32 = arith.constant 0 : i32
    %c0_i32_0 = arith.constant 0 : i32
    %c0_i32_1 = arith.constant 0 : i32
    return %c0_i32, %c0_i32_0 : i32, i32
  }
  func.func @transform_6(%arg0: i32) -> (i32, i32) {
    %c0_i32 = arith.constant 0 : i32
    %c0_i32_0 = arith.constant 0 : i32
    %c0_i32_1 = arith.constant 0 : i32
    return %c0_i32, %c0_i32_0 : i32, i32
  }
  func.func @transform_7(%arg0: i32) -> (i32, i32) {
    %c0_i32 = arith.constant 0 : i32
    %c0_i32_0 = arith.constant 0 : i32
    return %arg0, %c0_i32 : i32, i32
  }
}

</mosaic_0001>

<bundles_post_ra>
// kernel: tpu_custom_call.1
= control target key start
LH: loop header
LB: loop body
LE: loop exit
PB: predicated region body
PF: predicated region fallthrough
CT: control target
= control target key end

     0   :  { %v1023_v1 = vmov 0   ;;  %vm127_vm0 = vcmask 523264   ;;  %v77_v63 = vlaneseq  ;;  %vm814_vm1 = vcmask 7168   ;;  %s1484_s1 = inlined_call_operand.vmem [shape: bf16[64,256], index: 1, kind: input, shape index: {}]   ;;  %s1485_s0 = inlined_call_operand.vmem [shape: f32[200,64], index: 0, kind: input, shape index: {}]   ;;  %s1486_s3 = inlined_call_operand.vmem [shape: bf16[256,128], index: 3, kind: input, shape index: {}]   ;;  %s1487_s2 = inlined_call_operand.vmem [shape: f32[1,256], index: 2, kind: input, shape index: {}]   ;;  %s1488_s6 = inlined_call_operand.<no memory space> [shape: f32[1,1], index: 6, kind: input, shape index: {}]   ;;  %s1489_s4 = inlined_call_operand.vmem [shape: f32[1,128], index: 4, kind: input, shape index: {}]   ;;  %s1490_s5 = inlined_call_operand.vmem [shape: f32[1,128], index: 5, kind: input, shape index: {}]   ;;  %s1491_s7 = inlined_call_operand.vmem [shape: f32[200,1], index: 7, kind: output, shape index: {}]  }
   0x1   :  { %v995_v0 = vld [vmem:[%s1484_s1 + $0x4] ss:$8 sps:$4 sm:$0xff]   ;;  %199 = vmatprep.mubr.bf16.mxu0 %v1023_v1  ;;  %v997_v2 = vld [vmem:[%s1484_s1] ss:$8 sps:$4 sm:$0xff]   ;;  %v998_v3 = vld [vmem:[%s1484_s1 + $0x14] ss:$8 sps:$4 sm:$0xff]  }
   0x2   :  { %167 = vmatprep.subr.bf16.mxu0 %v995_v0  ;;  %v1000_v4 = vld [vmem:[%s1484_s1 + $0x10] ss:$8 sps:$4 sm:$0xff]   ;;  %v1001_v5 = vld [vmem:[%s1484_s1 + $0x24] ss:$8 sps:$4 sm:$0xff]   ;;  %v1003_v6 = vld [vmem:[%s1484_s1 + $0x20] ss:$8 sps:$4 sm:$0xff]  }
   0x3   :  { %168 = vmatpush1.bf16.msra.mxu0 %v997_v2  ;;  %v1004_v7 = vld [vmem:[%s1484_s1 + $0x34] ss:$8 sps:$4 sm:$0xff]   ;;  %v1006_v8 = vld [vmem:[%s1484_s1 + $0x30] ss:$8 sps:$4 sm:$0xff]   ;;  %v29_v9 = vld [vmem:[%s1485_s0] sm:$0xff]  ;;  %v78_v0 = vshrl.u32 %v77_v63, 7 }
   0x4   :  { %169 = vmatprep.subr.bf16.mxu0 %v998_v3  ;;  %v30_v10 = vld [vmem:[%s1485_s0 + $0x8] sm:$0xff]  ;;  %v1007_v12 = vld [vmem:[%s1486_s3 + $0x40] sm:$0xff]   ;;  %v31_v15 = vld [vmem:[%s1485_s0 + $0x10] sm:$0xff] }
   0x5   :  { %v54_v11 = vpack.c.bf16 %v30_v10, %v29_v9  ;;  %v1008_v13 = vld [vmem:[%s1486_s3] sm:$0xff]   ;;  %v1009_v14 = vld [vmem:[%s1486_s3 + $0x48] sm:$0xff]   ;;  %978 = vmatprep.subr.bf16.mxu1 %v1007_v12  ;;  %v32_v16 = vld [vmem:[%s1485_s0 + $0x18] sm:$0xff]  ;;  %v79_v2 = vsub.s32 0, %v78_v0  ;;  %v83_v3 = vsub.s32 1, %v78_v0 }
   0x6   :  { %986 = vmatpush3.bf16.msra.mxu1 %v1008_v13  ;;  %v1010_v17 = vld [vmem:[%s1486_s3 + $0x8] sm:$0xff]   ;;  %v1011_v18 = vld [vmem:[%s1486_s3 + $0x50] sm:$0xff]   ;;  %v55_v19 = vpack.c.bf16 %v32_v16, %v31_v15  ;;  %v1013_v21 = vld [vmem:[%s1486_s3 + $0x58] sm:$0xff]  }
   0x7   :  { %170 = vmatpush1.bf16.msra.mxu0 %v1000_v4  ;;  %979 = vmatprep.subr.bf16.mxu1 %v1009_v14  ;;  %v1012_v20 = vld [vmem:[%s1486_s3 + $0x10] sm:$0xff]   ;;  %v33_v22 = vld [vmem:[%s1485_s0 + $0x20] sm:$0xff]  ;;  %v34_v23 = vld [vmem:[%s1485_s0 + $0x28] sm:$0xff] }
   0x8   :  { %171 = vmatprep.subr.bf16.mxu0 %v1001_v5  ;;  %v1014_v24 = vld [vmem:[%s1486_s3 + $0x18] sm:$0xff]   ;;  %v1015_v25 = vld [vmem:[%s1486_s3 + $0x60] sm:$0xff]   ;;  %v56_v26 = vpack.c.bf16 %v34_v23, %v33_v22  ;;  %v1017_v28 = vld [vmem:[%s1486_s3 + $0x68] sm:$0xff]  }
   0x9   :  { %v1016_v27 = vld [vmem:[%s1486_s3 + $0x20] sm:$0xff]   ;;  %v35_v29 = vld [vmem:[%s1485_s0 + $0x30] sm:$0xff]  ;;  %v36_v30 = vld [vmem:[%s1485_s0 + $0x38] sm:$0xff] }
   0xa   :  { %987 = vmatpush3.bf16.msra.mxu1 %v1010_v17  ;;  %v57_v31 = vpack.c.bf16 %v36_v30, %v35_v29  ;;  %v37_v32 = vld [vmem:[%s1485_s0 + $0x40] sm:$0xff]  ;;  %v38_v33 = vld [vmem:[%s1485_s0 + $0x48] sm:$0xff]  ;;  %v39_v35 = vld [vmem:[%s1485_s0 + $0x50] sm:$0xff] }
   0xb   :  { %172 = vmatpush1.bf16.msra.mxu0 %v1003_v6  ;;  %980 = vmatprep.subr.bf16.mxu1 %v1011_v18  ;;  %v58_v34 = vpack.c.bf16 %v38_v33, %v37_v32  ;;  %v40_v36 = vld [vmem:[%s1485_s0 + $0x58] sm:$0xff]  ;;  %v41_v38 = vld [vmem:[%s1485_s0 + $0x60] sm:$0xff]  ;;  %v42_v39 = vld [vmem:[%s1485_s0 + $0x68] sm:$0xff] }
   0xc   :  { %173 = vmatprep.subr.bf16.mxu0 %v1004_v7  ;;  %v59_v37 = vpack.c.bf16 %v40_v36, %v39_v35  ;;  %v60_v40 = vpack.c.bf16 %v42_v39, %v41_v38  ;;  %v43_v41 = vld [vmem:[%s1485_s0 + $0x70] sm:$0xff]  ;;  %v44_v42 = vld [vmem:[%s1485_s0 + $0x78] sm:$0xff]  ;;  %v45_v44 = vld [vmem:[%s1485_s0 + $0x80] sm:$0xff] }
   0xd   :  { %v61_v43 = vpack.c.bf16 %v44_v42, %v43_v41  ;;  %v46_v45 = vld [vmem:[%s1485_s0 + $0x88] sm:$0xff]  ;;  %v47_v47 = vld [vmem:[%s1485_s0 + $0x90] sm:$0xff]  ;;  %v48_v48 = vld [vmem:[%s1485_s0 + $0x98] sm:$0xff] }
   0xe   :  { %988 = vmatpush3.bf16.msra.mxu1 %v1012_v20  ;;  %v62_v46 = vpack.c.bf16 %v46_v45, %v45_v44  ;;  %v63_v49 = vpack.c.bf16 %v48_v48, %v47_v47  ;;  %v49_v50 = vld [vmem:[%s1485_s0 + $0xa0] sm:$0xff]  ;;  %v50_v51 = vld [vmem:[%s1485_s0 + $0xa8] sm:$0xff]  ;;  %v51_v53 = vld [vmem:[%s1485_s0 + $0xb0] sm:$0xff] }
   0xf   :  { %174 = vmatpush1.bf16.msra.mxu0 %v1006_v8  ;;  %981 = vmatprep.subr.bf16.mxu1 %v1013_v21  ;;  %v64_v52 = vpack.c.bf16 %v50_v51, %v49_v50  ;;  %v52_v54 = vld [vmem:[%s1485_s0 + $0xb8] sm:$0xff]  ;;  %v1018_v55 = vld [vmem:[%s1486_s3 + $0x28] sm:$0xff]   ;;  %v1019_v57 = vld [vmem:[%s1486_s3 + $0x70] sm:$0xff]  }
  0x10   :  { %884 = vmatprep.subr.bf16.mxu0 %v1007_v12  ;;  %v65_v56 = vpack.c.bf16 %v52_v54, %v51_v53  ;;  %v1020_v58 = vld [vmem:[%s1486_s3 + $0x30] sm:$0xff]   ;;  %v1021_v59 = vld [vmem:[%s1486_s3 + $0x78] sm:$0xff]   ;;  %v53_v60 = vld [vmem:[%s1485_s0 + $0xc0] sm:$0xff] }
  0x11   :  { %v1022_v61 = vld [vmem:[%s1486_s3 + $0x38] sm:$0xff]   ;;  %v66_v62 = vpack.c.bf16 %v53_v60, %v53_v60 }
  0x12   :  { %852 = vmatmul.mubr.msk.bf16.vlgmr.msra.gmra.mrb[0].mxu0 %vm127_vm0, %v54_v11  ;;  %989 = vmatpush3.bf16.msra.mxu1 %v1014_v24 }
  0x13   :  { %209 = vmatprep.mubr.bf16.mxu0 %v1023_v1  ;;  %885 = vmatpush3.bf16.msra.mxu0 %v1008_v13 }
  0x14   :  { %886 = vmatprep.subr.bf16.mxu0 %v1009_v14  ;;  %982 = vmatprep.subr.bf16.mxu1 %v1015_v25 }
  0x16   :  { %990 = vmatpush3.bf16.msra.mxu1 %v1016_v27 }
  0x17   :  { %887 = vmatpush3.bf16.msra.mxu0 %v1010_v17  ;;  %983 = vmatprep.subr.bf16.mxu1 %v1017_v28 }
  0x18   :  { %888 = vmatprep.subr.bf16.mxu0 %v1011_v18 }
  0x1a   :  { %853 = vmatmul.mubr.msk.bf16.gmra.mrb[4].mxu0 %vm127_vm0, %v55_v19  ;;  %991 = vmatpush3.bf16.msra.mxu1 %v1018_v55 }
  0x1b   :  { %219 = vmatprep.mubr.bf16.mxu0 %v1023_v1  ;;  %889 = vmatpush3.bf16.msra.mxu0 %v1012_v20 }
  0x1c   :  { %890 = vmatprep.subr.bf16.mxu0 %v1013_v21  ;;  %984 = vmatprep.subr.bf16.mxu1 %v1019_v57 }
  0x1e   :  { %992 = vmatpush3.bf16.msra.mxu1 %v1020_v58 }
  0x1f   :  { %891 = vmatpush3.bf16.msra.mxu0 %v1014_v24  ;;  %985 = vmatprep.subr.bf16.mxu1 %v1021_v59 }
  0x20   :  { %892 = vmatprep.subr.bf16.mxu0 %v1015_v25 }
  0x22   :  { %854 = vmatmul.mubr.msk.bf16.gmra.mrb[8].mxu0 %vm127_vm0, %v56_v26  ;;  %993 = vmatpush3.bf16.msra.mxu1 %v1022_v61 }
  0x23   :  { %229 = vmatprep.mubr.bf16.mxu0 %v1023_v1  ;;  %893 = vmatpush3.bf16.msra.mxu0 %v1016_v27 }
  0x24   :  { %894 = vmatprep.subr.bf16.mxu0 %v1017_v28 }
  0x27   :  { %895 = vmatpush3.bf16.msra.mxu0 %v1018_v55 }
  0x28   :  { %896 = vmatprep.subr.bf16.mxu0 %v1019_v57 }
  0x2a   :  { %855 = vmatmul.mubr.msk.bf16.gmra.mrb[12].mxu0 %vm127_vm0, %v57_v31 }
  0x2b   :  { %239 = vmatprep.mubr.bf16.mxu0 %v1023_v1  ;;  %897 = vmatpush3.bf16.msra.mxu0 %v1020_v58 }
  0x2c   :  { %898 = vmatprep.subr.bf16.mxu0 %v1021_v59 }
  0x2f   :  { %899 = vmatpush3.bf16.msra.mxu0 %v1022_v61 }
  0x32   :  { %856 = vmatmul.mubr.msk.bf16.gmra.mrb[16].mxu0 %vm127_vm0, %v58_v34 }
  0x33   :  { %249 = vmatprep.mubr.bf16.mxu0 %v1023_v1 }
  0x3a   :  { %857 = vmatmul.mubr.msk.bf16.gmra.mrb[20].mxu0 %vm127_vm0, %v59_v37 }
  0x3b   :  { %259 = vmatprep.mubr.bf16.mxu0 %v1023_v1 }
  0x42   :  { %858 = vmatmul.mubr.msk.bf16.gmra.mrb[24].mxu0 %vm127_vm0, %v60_v40 }
  0x43   :  { %269 = vmatprep.mubr.bf16.mxu0 %v1023_v1 }
  0x4a   :  { %859 = vmatmul.mubr.msk.bf16.gmra.mrb[28].mxu0 %vm127_vm0, %v61_v43 }
  0x4b   :  { %279 = vmatprep.mubr.bf16.mxu0 %v1023_v1 }
  0x52   :  { %860 = vmatmul.mubr.msk.bf16.gmra.mrb[32].mxu0 %vm127_vm0, %v62_v46 }
  0x53   :  { %289 = vmatprep.mubr.bf16.mxu0 %v1023_v1 }
  0x5a   :  { %861 = vmatmul.mubr.msk.bf16.gmra.mrb[36].mxu0 %vm127_vm0, %v63_v49 }
  0x5b   :  { %299 = vmatprep.mubr.bf16.mxu0 %v1023_v1 }
  0x62   :  { %862 = vmatmul.mubr.msk.bf16.gmra.mrb[40].mxu0 %vm127_vm0, %v64_v52 }
  0x63   :  { %309 = vmatprep.mubr.bf16.mxu0 %v1023_v1 }
  0x6a   :  { %863 = vmatmul.mubr.msk.bf16.gmra.mrb[44].mxu0 %vm127_vm0, %v65_v56 }
  0x6b   :  { %319 = vmatprep.mubr.bf16.mxu0 %v1023_v1  ;;  %v75_v1 = vld [vmem:[%s1487_s2] sm:$0x3] }
  0x6c   :  { %v1240_v4 = vrot.slane %v75_v1, %v79_v2  ;;  %v1242_v5 = vrot.slane %v75_v1, %v83_v3 }
  0x72   :  { %864 = vmatmul.mubr.msk.bf16.gmra.mrb[48].mxu0 %vm127_vm0, %v66_v62 }
  0xe5   :  { %v201_v6 = vpop.f32.mrb[0].mxu0 }
  0xe6   :  { %v202_v7 = vadd.f32 %v201_v6, %v1240_v4  ;;  %v203_v8 = vpop.f32.mrb[1].mxu0 }
  0xe7   :  { %v204_v9 = vadd.f32 %v203_v8, %v1242_v5  ;;  %v205_v10 = vpop.f32.mrb[2].mxu0 }
  0xe8   :  { %v206_v11 = vadd.f32 %v205_v10, %v1240_v4  ;;  %v207_v12 = vpop.f32.mrb[3].mxu0  ;;  %v328_v14 = vmax.f32 %v202_v7, 0.0 }
  0xe9   :  { %v208_v13 = vadd.f32 %v207_v12, %v1242_v5  ;;  %v329_v16 = vmax.f32 %v204_v9, 0.0 }
  0xea   :  { %v330_v15 = vmax.f32 %v206_v11, 0.0 }
  0xeb   :  { %v331_v17 = vmax.f32 %v208_v13, 0.0 }
  0xec   :  { %v378_v18 = vpack.c.bf16 %v330_v15, %v328_v14 }
  0xed   :  { %v379_v19 = vpack.c.bf16 %v331_v17, %v329_v16  ;;  %v211_v20 = vpop.f32.mrb[4].mxu0 }
  0xee   :  { %v212_v21 = vadd.f32 %v211_v20, %v1240_v4  ;;  %v213_v22 = vpop.f32.mrb[5].mxu0 }
  0xef   :  { %v214_v23 = vadd.f32 %v213_v22, %v1242_v5  ;;  %v215_v24 = vpop.f32.mrb[6].mxu0  ;;  %571 = vmatprep.mubr.bf16.mxu0 %v379_v19 }
  0xf0   :  { %v216_v25 = vadd.f32 %v215_v24, %v1240_v4  ;;  %v217_v26 = vpop.f32.mrb[7].mxu0  ;;  %572 = vmatmul.mubr.bf16.vlgmr.msra.gmra.mrb[52].mxu0 %v378_v18  ;;  %v332_v28 = vmax.f32 %v212_v21, 0.0 }
  0xf1   :  { %v218_v27 = vadd.f32 %v217_v26, %v1242_v5  ;;  %v333_v30 = vmax.f32 %v214_v23, 0.0 }
  0xf2   :  { %v334_v29 = vmax.f32 %v216_v25, 0.0 }
  0xf3   :  { %v335_v31 = vmax.f32 %v218_v27, 0.0 }
  0xf4   :  { %v380_v32 = vpack.c.bf16 %v334_v29, %v332_v28 }
  0xf5   :  { %v221_v33 = vpop.f32.mrb[8].mxu0  ;;  %v381_v34 = vpack.c.bf16 %v335_v31, %v333_v30 }
  0xf6   :  { %v222_v35 = vadd.f32 %v221_v33, %v1240_v4  ;;  %v223_v36 = vpop.f32.mrb[9].mxu0 }
  0xf7   :  { %v224_v37 = vadd.f32 %v223_v36, %v1242_v5  ;;  %v225_v38 = vpop.f32.mrb[10].mxu0  ;;  %579 = vmatprep.mubr.bf16.mxu1 %v381_v34 }
  0xf8   :  { %v226_v39 = vadd.f32 %v225_v38, %v1240_v4  ;;  %v227_v40 = vpop.f32.mrb[11].mxu0  ;;  %580 = vmatmul.mubr.bf16.vlgmr.msra.gmra.mrb[0].mxu1 %v380_v32  ;;  %v336_v42 = vmax.f32 %v222_v35, 0.0 }
  0xf9   :  { %v228_v41 = vadd.f32 %v227_v40, %v1242_v5  ;;  %v337_v44 = vmax.f32 %v224_v37, 0.0 }
  0xfa   :  { %v338_v43 = vmax.f32 %v226_v39, 0.0 }
  0xfb   :  { %v339_v45 = vmax.f32 %v228_v41, 0.0 }
  0xfc   :  { %v382_v46 = vpack.c.bf16 %v338_v43, %v336_v42 }
  0xfd   :  { %v383_v47 = vpack.c.bf16 %v339_v45, %v337_v44  ;;  %v231_v48 = vpop.f32.mrb[12].mxu0 }
  0xfe   :  { %v232_v49 = vadd.f32 %v231_v48, %v1240_v4  ;;  %v233_v50 = vpop.f32.mrb[13].mxu0 }
  0xff   :  { %v234_v51 = vadd.f32 %v233_v50, %v1242_v5  ;;  %v235_v52 = vpop.f32.mrb[14].mxu0  ;;  %587 = vmatprep.mubr.bf16.mxu1 %v383_v47 }
 0x100   :  { %v236_v53 = vadd.f32 %v235_v52, %v1240_v4  ;;  %v237_v54 = vpop.f32.mrb[15].mxu0  ;;  %588 = vmatmul.mubr.bf16.gmra.mrb[4].mxu1 %v382_v46  ;;  %v340_v56 = vmax.f32 %v232_v49, 0.0 }
 0x101   :  { %v238_v55 = vadd.f32 %v237_v54, %v1242_v5  ;;  %v341_v58 = vmax.f32 %v234_v51, 0.0 }
 0x102   :  { %v342_v57 = vmax.f32 %v236_v53, 0.0 }
 0x103   :  { %v343_v59 = vmax.f32 %v238_v55, 0.0 }
 0x104   :  { %v384_v60 = vpack.c.bf16 %v342_v57, %v340_v56 }
 0x105   :  { %v385_v61 = vpack.c.bf16 %v343_v59, %v341_v58  ;;  %v241_v62 = vpop.f32.mrb[16].mxu0 }
 0x106   :  { %v242_v63 = vadd.f32 %v241_v62, %v1240_v4  ;;  %v243_v0 = vpop.f32.mrb[17].mxu0 }
 0x107   :  { %v244_v2 = vadd.f32 %v243_v0, %v1242_v5  ;;  %v245_v1 = vpop.f32.mrb[18].mxu0  ;;  %595 = vmatprep.mubr.bf16.mxu1 %v385_v61 }
 0x108   :  { %v246_v3 = vadd.f32 %v245_v1, %v1240_v4  ;;  %v247_v6 = vpop.f32.mrb[19].mxu0  ;;  %596 = vmatmul.mubr.bf16.gmra.mrb[8].mxu1 %v384_v60  ;;  %v344_v8 = vmax.f32 %v242_v63, 0.0 }
 0x109   :  { %v248_v7 = vadd.f32 %v247_v6, %v1242_v5  ;;  %v345_v10 = vmax.f32 %v244_v2, 0.0 }
 0x10a   :  { %v346_v9 = vmax.f32 %v246_v3, 0.0 }
 0x10b   :  { %v347_v11 = vmax.f32 %v248_v7, 0.0 }
 0x10c   :  { %v386_v12 = vpack.c.bf16 %v346_v9, %v344_v8 }
 0x10d   :  { %v387_v13 = vpack.c.bf16 %v347_v11, %v345_v10  ;;  %v251_v14 = vpop.f32.mrb[20].mxu0 }
 0x10e   :  { %v252_v15 = vadd.f32 %v251_v14, %v1240_v4  ;;  %v253_v16 = vpop.f32.mrb[21].mxu0 }
 0x10f   :  { %v254_v17 = vadd.f32 %v253_v16, %v1242_v5  ;;  %v255_v18 = vpop.f32.mrb[22].mxu0  ;;  %603 = vmatprep.mubr.bf16.mxu1 %v387_v13 }
 0x110   :  { %v256_v19 = vadd.f32 %v255_v18, %v1240_v4  ;;  %v257_v20 = vpop.f32.mrb[23].mxu0  ;;  %604 = vmatmul.mubr.bf16.gmra.mrb[12].mxu1 %v386_v12  ;;  %v348_v22 = vmax.f32 %v252_v15, 0.0 }
 0x111   :  { %v258_v21 = vadd.f32 %v257_v20, %v1242_v5  ;;  %v349_v24 = vmax.f32 %v254_v17, 0.0 }
 0x112   :  { %v350_v23 = vmax.f32 %v256_v19, 0.0 }
 0x113   :  { %v351_v25 = vmax.f32 %v258_v21, 0.0 }
 0x114   :  { %v388_v26 = vpack.c.bf16 %v350_v23, %v348_v22 }
 0x115   :  { %v389_v27 = vpack.c.bf16 %v351_v25, %v349_v24  ;;  %v261_v28 = vpop.f32.mrb[24].mxu0 }
 0x116   :  { %v262_v29 = vadd.f32 %v261_v28, %v1240_v4  ;;  %v263_v30 = vpop.f32.mrb[25].mxu0 }
 0x117   :  { %v264_v31 = vadd.f32 %v263_v30, %v1242_v5  ;;  %v265_v32 = vpop.f32.mrb[26].mxu0  ;;  %611 = vmatprep.mubr.bf16.mxu1 %v389_v27 }
 0x118   :  { %v266_v33 = vadd.f32 %v265_v32, %v1240_v4  ;;  %v267_v34 = vpop.f32.mrb[27].mxu0  ;;  %612 = vmatmul.mubr.bf16.gmra.mrb[16].mxu1 %v388_v26  ;;  %v352_v36 = vmax.f32 %v262_v29, 0.0 }
 0x119   :  { %v268_v35 = vadd.f32 %v267_v34, %v1242_v5  ;;  %v353_v38 = vmax.f32 %v264_v31, 0.0 }
 0x11a   :  { %v354_v37 = vmax.f32 %v266_v33, 0.0 }
 0x11b   :  { %v355_v39 = vmax.f32 %v268_v35, 0.0 }
 0x11c   :  { %v390_v40 = vpack.c.bf16 %v354_v37, %v352_v36 }
 0x11d   :  { %v391_v41 = vpack.c.bf16 %v355_v39, %v353_v38  ;;  %v271_v42 = vpop.f32.mrb[28].mxu0 }
 0x11e   :  { %v272_v43 = vadd.f32 %v271_v42, %v1240_v4  ;;  %v273_v44 = vpop.f32.mrb[29].mxu0 }
 0x11f   :  { %v274_v45 = vadd.f32 %v273_v44, %v1242_v5  ;;  %v275_v46 = vpop.f32.mrb[30].mxu0  ;;  %619 = vmatprep.mubr.bf16.mxu1 %v391_v41 }
 0x120   :  { %v276_v47 = vadd.f32 %v275_v46, %v1240_v4  ;;  %v277_v48 = vpop.f32.mrb[31].mxu0  ;;  %620 = vmatmul.mubr.bf16.gmra.mrb[20].mxu1 %v390_v40  ;;  %v356_v50 = vmax.f32 %v272_v43, 0.0 }
 0x121   :  { %v278_v49 = vadd.f32 %v277_v48, %v1242_v5  ;;  %v357_v52 = vmax.f32 %v274_v45, 0.0 }
 0x122   :  { %v358_v51 = vmax.f32 %v276_v47, 0.0 }
 0x123   :  { %v359_v53 = vmax.f32 %v278_v49, 0.0 }
 0x124   :  { %v392_v54 = vpack.c.bf16 %v358_v51, %v356_v50 }
 0x125   :  { %v393_v55 = vpack.c.bf16 %v359_v53, %v357_v52  ;;  %v281_v56 = vpop.f32.mrb[32].mxu0 }
 0x126   :  { %v282_v57 = vadd.f32 %v281_v56, %v1240_v4  ;;  %v283_v58 = vpop.f32.mrb[33].mxu0 }
 0x127   :  { %v284_v59 = vadd.f32 %v283_v58, %v1242_v5  ;;  %v285_v60 = vpop.f32.mrb[34].mxu0  ;;  %627 = vmatprep.mubr.bf16.mxu1 %v393_v55 }
 0x128   :  { %v286_v61 = vadd.f32 %v285_v60, %v1240_v4  ;;  %v287_v62 = vpop.f32.mrb[35].mxu0  ;;  %628 = vmatmul.mubr.bf16.gmra.mrb[24].mxu1 %v392_v54  ;;  %v360_v0 = vmax.f32 %v282_v57, 0.0  ;;  %v12_v60 = vstv %s1488_s6 }
 0x129   :  { %v288_v63 = vadd.f32 %v287_v62, %v1242_v5  ;;  %v361_v1 = vmax.f32 %v284_v59, 0.0  ;;  %13 = vst [vmem:[#allocation2] sm:$0x1] %v12_v60 }
 0x12a   :  { %v362_v2 = vmax.f32 %v286_v61, 0.0 }
 0x12b   :  { %v363_v3 = vmax.f32 %v288_v63, 0.0 }
 0x12c   :  { %v394_v6 = vpack.c.bf16 %v362_v2, %v360_v0 }
 0x12d   :  { %v395_v7 = vpack.c.bf16 %v363_v3, %v361_v1  ;;  %v291_v8 = vpop.f32.mrb[36].mxu0  ;;  %v1306_v3 = vld [vmem:[%s1490_s5] ss:$0 sm:$0xff] }
 0x12e   :  { %v292_v9 = vadd.f32 %v291_v8, %v1240_v4  ;;  %v293_v10 = vpop.f32.mrb[37].mxu0 }
 0x12f   :  { %v294_v11 = vadd.f32 %v293_v10, %v1242_v5  ;;  %v295_v12 = vpop.f32.mrb[38].mxu0  ;;  %635 = vmatprep.mubr.bf16.mxu1 %v395_v7 }
 0x130   :  { %v296_v13 = vadd.f32 %v295_v12, %v1240_v4  ;;  %v297_v14 = vpop.f32.mrb[39].mxu0  ;;  %636 = vmatmul.mubr.bf16.gmra.mrb[28].mxu1 %v394_v6  ;;  %v364_v16 = vmax.f32 %v292_v9, 0.0 }
 0x131   :  { %v298_v15 = vadd.f32 %v297_v14, %v1242_v5  ;;  %v365_v18 = vmax.f32 %v294_v11, 0.0 }
 0x132   :  { %v366_v17 = vmax.f32 %v296_v13, 0.0 }
 0x133   :  { %v367_v19 = vmax.f32 %v298_v15, 0.0 }
 0x134   :  { %v396_v20 = vpack.c.bf16 %v366_v17, %v364_v16 }
 0x135   :  { %v397_v21 = vpack.c.bf16 %v367_v19, %v365_v18  ;;  %v301_v22 = vpop.f32.mrb[40].mxu0 }
 0x136   :  { %v302_v23 = vadd.f32 %v301_v22, %v1240_v4  ;;  %v303_v24 = vpop.f32.mrb[41].mxu0 }
 0x137   :  { %v304_v25 = vadd.f32 %v303_v24, %v1242_v5  ;;  %v305_v26 = vpop.f32.mrb[42].mxu0  ;;  %643 = vmatprep.mubr.bf16.mxu1 %v397_v21 }
 0x138   :  { %v306_v27 = vadd.f32 %v305_v26, %v1240_v4  ;;  %v307_v28 = vpop.f32.mrb[43].mxu0  ;;  %644 = vmatmul.mubr.bf16.gmra.mrb[32].mxu1 %v396_v20  ;;  %v368_v30 = vmax.f32 %v302_v23, 0.0 }
 0x139   :  { %v308_v29 = vadd.f32 %v307_v28, %v1242_v5  ;;  %v369_v32 = vmax.f32 %v304_v25, 0.0 }
 0x13a   :  { %v370_v31 = vmax.f32 %v306_v27, 0.0 }
 0x13b   :  { %v371_v33 = vmax.f32 %v308_v29, 0.0 }
 0x13c   :  { %v398_v34 = vpack.c.bf16 %v370_v31, %v368_v30 }
 0x13d   :  { %v399_v35 = vpack.c.bf16 %v371_v33, %v369_v32  ;;  %v311_v36 = vpop.f32.mrb[44].mxu0 }
 0x13e   :  { %v312_v37 = vadd.f32 %v311_v36, %v1240_v4  ;;  %v313_v38 = vpop.f32.mrb[45].mxu0 }
 0x13f   :  { %v314_v39 = vadd.f32 %v313_v38, %v1242_v5  ;;  %v315_v40 = vpop.f32.mrb[46].mxu0  ;;  %651 = vmatprep.mubr.bf16.mxu1 %v399_v35 }
 0x140   :  { %v316_v41 = vadd.f32 %v315_v40, %v1240_v4  ;;  %v317_v42 = vpop.f32.mrb[47].mxu0  ;;  %652 = vmatmul.mubr.bf16.gmra.mrb[36].mxu1 %v398_v34  ;;  %v372_v44 = vmax.f32 %v312_v37, 0.0 }
 0x141   :  { %v318_v43 = vadd.f32 %v317_v42, %v1242_v5  ;;  %v373_v46 = vmax.f32 %v314_v39, 0.0 }
 0x142   :  { %v374_v45 = vmax.f32 %v316_v41, 0.0 }
 0x143   :  { %v375_v47 = vmax.f32 %v318_v43, 0.0 }
 0x144   :  { %v400_v48 = vpack.c.bf16 %v374_v45, %v372_v44 }
 0x145   :  { %v401_v49 = vpack.c.bf16 %v375_v47, %v373_v46  ;;  %v321_v50 = vpop.f32.mrb[48].mxu0 }
 0x146   :  { %v322_v51 = vadd.f32 %v321_v50, %v1240_v4  ;;  %v323_v52 = vpop.f32.mrb[49].mxu0 }
 0x147   :  { %v324_v53 = vadd.f32 %v323_v52, %v1242_v5  ;;  %v325_v54 = vpop.f32.mrb[50].mxu0  ;;  %659 = vmatprep.mubr.bf16.mxu1 %v401_v49  ;;  %v1300_v5 = vld [vmem:[%s1489_s4] ss:$0 sm:$0xff] }
 0x148   :  { %v326_v55 = vpop.f32.mrb[51].mxu0  ;;  %660 = vmatmul.mubr.bf16.gmra.mrb[40].mxu1 %v400_v48  ;;  %v376_v57 = vmax.f32 %v322_v51, 0.0 }
 0x149   :  { %v377_v56 = vmax.f32 %v324_v53, 0.0 }
 0x14a   :  { %v402_v59 = vpack.c.bf16 %v376_v57, %v376_v57 }
 0x14b   :  { %v403_v58 = vpack.c.bf16 %v377_v56, %v377_v56 }
 0x14d   :  { %667 = vmatprep.mubr.bf16.mxu1 %v403_v58 }
 0x150   :  { %668 = vmatmul.mubr.bf16.gmra.mrb[44].mxu1 %v402_v59 }
 0x1c3   :  { %v900_v61 = vpop.f32.mrb[52].mxu0 }
 0x1c4   :  { %v901_v4 = vpop.f32.mrb[53].mxu0 }
 0x1c5   :  { %v902_v62 = vadd.f32 %v901_v4, %v900_v61  ;;  %v903_v63 = vpop.f32.mrb[54].mxu0 }
 0x1c6   :  { %v904_v0 = vpop.f32.mrb[55].mxu0 }
 0x1c7   :  { %v905_v2 = vadd.f32 %v904_v0, %v903_v63  ;;  %v574_v1 = vadd.f32 %v902_v62, %v1300_v5 }
 0x1c9   :  { %v577_v6 = vadd.f32 %v905_v2, %v1300_v5  ;;  %v675_v7 = vmax.f32 %v574_v1, 0.0 }
 0x1cb   :  { %v676_v8 = vmax.f32 %v577_v6, 0.0  ;;  %v906_v9 = vpop.f32.mrb[0].mxu1  ;;  %v707_v10 = vmul.f32 %v1306_v3, %v675_v7 }
 0x1cc   :  { %v907_v11 = vpop.f32.mrb[1].mxu1 }
 0x1cd   :  { %v908_v12 = vadd.f32 %v907_v11, %v906_v9  ;;  %v909_v13 = vpop.f32.mrb[2].mxu1  ;;  %732 = vadd.xlane.f32.xlu0 %v707_v10  ;;  %v708_v16 = vmul.f32 %v1306_v3, %v676_v8 }
 0x1ce   :  { %v910_v14 = vpop.f32.mrb[3].mxu1 }
 0x1cf   :  { %v911_v15 = vadd.f32 %v910_v14, %v909_v13  ;;  %v582_v17 = vadd.f32 %v908_v12, %v1300_v5 }
 0x1d1   :  { %v585_v18 = vadd.f32 %v911_v15, %v1300_v5  ;;  %734 = vadd.xlane.f32.xlu0 %v708_v16  ;;  %v677_v19 = vmax.f32 %v582_v17, 0.0 }
 0x1d3   :  { %v678_v20 = vmax.f32 %v585_v18, 0.0  ;;  %v912_v21 = vpop.f32.mrb[4].mxu1  ;;  %v709_v22 = vmul.f32 %v1306_v3, %v677_v19 }
 0x1d4   :  { %v913_v23 = vpop.f32.mrb[5].mxu1 }
 0x1d5   :  { %v914_v24 = vadd.f32 %v913_v23, %v912_v21  ;;  %v915_v25 = vpop.f32.mrb[6].mxu1  ;;  %736 = vadd.xlane.f32.xlu1 %v709_v22  ;;  %v710_v29 = vmul.f32 %v1306_v3, %v678_v20 }
 0x1d6   :  { %v916_v26 = vpop.f32.mrb[7].mxu1 }
 0x1d7   :  { %v590_v27 = vadd.f32 %v914_v24, %v1300_v5  ;;  %v917_v28 = vadd.f32 %v916_v26, %v915_v25 }
 0x1d9   :  { %v679_v30 = vmax.f32 %v590_v27, 0.0  ;;  %v593_v31 = vadd.f32 %v917_v28, %v1300_v5  ;;  %738 = vadd.xlane.f32.xlu1 %v710_v29 }
 0x1db   :  { %v680_v32 = vmax.f32 %v593_v31, 0.0  ;;  %v918_v33 = vpop.f32.mrb[8].mxu1  ;;  %v711_v34 = vmul.f32 %v1306_v3, %v679_v30 }
 0x1dc   :  { %v919_v35 = vpop.f32.mrb[9].mxu1 }
 0x1dd   :  { %v920_v36 = vadd.f32 %v919_v35, %v918_v33  ;;  %v921_v37 = vpop.f32.mrb[10].mxu1  ;;  %740 = vadd.xlane.f32.xlu0 %v711_v34  ;;  %v712_v38 = vmul.f32 %v1306_v3, %v680_v32 }
 0x1de   :  { %v922_v39 = vpop.f32.mrb[11].mxu1 }
 0x1df   :  { %v598_v40 = vadd.f32 %v920_v36, %v1300_v5  ;;  %v923_v41 = vadd.f32 %v922_v39, %v921_v37  ;;  %742 = vadd.xlane.f32.xlu1 %v712_v38 }
 0x1e1   :  { %v681_v42 = vmax.f32 %v598_v40, 0.0  ;;  %v601_v43 = vadd.f32 %v923_v41, %v1300_v5 }
 0x1e3   :  { %v682_v44 = vmax.f32 %v601_v43, 0.0  ;;  %v924_v45 = vpop.f32.mrb[12].mxu1  ;;  %v713_v46 = vmul.f32 %v1306_v3, %v681_v42 }
 0x1e4   :  { %v925_v47 = vpop.f32.mrb[13].mxu1 }
 0x1e5   :  { %v926_v48 = vadd.f32 %v925_v47, %v924_v45  ;;  %v927_v49 = vpop.f32.mrb[14].mxu1  ;;  %744 = vadd.xlane.f32.xlu0 %v713_v46  ;;  %v714_v50 = vmul.f32 %v1306_v3, %v682_v44 }
 0x1e6   :  { %v928_v51 = vpop.f32.mrb[15].mxu1 }
 0x1e7   :  { %v606_v52 = vadd.f32 %v926_v48, %v1300_v5  ;;  %v929_v53 = vadd.f32 %v928_v51, %v927_v49  ;;  %746 = vadd.xlane.f32.xlu1 %v714_v50 }
 0x1e9   :  { %v683_v54 = vmax.f32 %v606_v52, 0.0  ;;  %v609_v55 = vadd.f32 %v929_v53, %v1300_v5 }
 0x1eb   :  { %v684_v56 = vmax.f32 %v609_v55, 0.0  ;;  %v930_v57 = vpop.f32.mrb[16].mxu1  ;;  %v715_v58 = vmul.f32 %v1306_v3, %v683_v54 }
 0x1ec   :  { %v931_v59 = vpop.f32.mrb[17].mxu1 }
 0x1ed   :  { %v932_v60 = vadd.f32 %v931_v59, %v930_v57  ;;  %v933_v61 = vpop.f32.mrb[18].mxu1  ;;  %748 = vadd.xlane.f32.xlu0 %v715_v58  ;;  %v716_v4 = vmul.f32 %v1306_v3, %v684_v56 }
 0x1ee   :  { %v934_v62 = vpop.f32.mrb[19].mxu1 }
 0x1ef   :  { %v614_v63 = vadd.f32 %v932_v60, %v1300_v5  ;;  %v935_v0 = vadd.f32 %v934_v62, %v933_v61  ;;  %750 = vadd.xlane.f32.xlu1 %v716_v4 }
 0x1f1   :  { %v685_v2 = vmax.f32 %v614_v63, 0.0  ;;  %v617_v1 = vadd.f32 %v935_v0, %v1300_v5 }
 0x1f3   :  { %v686_v6 = vmax.f32 %v617_v1, 0.0  ;;  %v936_v7 = vpop.f32.mrb[20].mxu1  ;;  %v717_v8 = vmul.f32 %v1306_v3, %v685_v2 }
 0x1f4   :  { %v937_v9 = vpop.f32.mrb[21].mxu1 }
 0x1f5   :  { %v938_v10 = vadd.f32 %v937_v9, %v936_v7  ;;  %v939_v11 = vpop.f32.mrb[22].mxu1  ;;  %752 = vadd.xlane.f32.xlu0 %v717_v8  ;;  %v718_v12 = vmul.f32 %v1306_v3, %v686_v6 }
 0x1f6   :  { %v940_v13 = vpop.f32.mrb[23].mxu1 }
 0x1f7   :  { %v622_v14 = vadd.f32 %v938_v10, %v1300_v5  ;;  %v941_v15 = vadd.f32 %v940_v13, %v939_v11  ;;  %754 = vadd.xlane.f32.xlu1 %v718_v12 }
 0x1f9   :  { %v687_v16 = vmax.f32 %v622_v14, 0.0  ;;  %v625_v17 = vadd.f32 %v941_v15, %v1300_v5 }
 0x1fb   :  { %v688_v18 = vmax.f32 %v625_v17, 0.0  ;;  %v942_v19 = vpop.f32.mrb[24].mxu1  ;;  %v719_v20 = vmul.f32 %v1306_v3, %v687_v16 }
 0x1fc   :  { %v943_v21 = vpop.f32.mrb[25].mxu1 }
 0x1fd   :  { %v944_v22 = vadd.f32 %v943_v21, %v942_v19  ;;  %v945_v23 = vpop.f32.mrb[26].mxu1  ;;  %756 = vadd.xlane.f32.xlu0 %v719_v20  ;;  %v720_v24 = vmul.f32 %v1306_v3, %v688_v18 }
 0x1fe   :  { %v946_v25 = vpop.f32.mrb[27].mxu1 }
 0x1ff   :  { %v630_v26 = vadd.f32 %v944_v22, %v1300_v5  ;;  %v947_v27 = vadd.f32 %v946_v25, %v945_v23  ;;  %758 = vadd.xlane.f32.xlu1 %v720_v24 }
 0x201   :  { %v689_v28 = vmax.f32 %v630_v26, 0.0  ;;  %v633_v29 = vadd.f32 %v947_v27, %v1300_v5  ;;  %v1357_v27 = vld [vmem:[#allocation2] ss:$0 sm:$0xff] }
 0x203   :  { %v690_v30 = vmax.f32 %v633_v29, 0.0  ;;  %v948_v31 = vpop.f32.mrb[28].mxu1  ;;  %v721_v32 = vmul.f32 %v1306_v3, %v689_v28 }
 0x204   :  { %v949_v33 = vpop.f32.mrb[29].mxu1 }
 0x205   :  { %v950_v34 = vadd.f32 %v949_v33, %v948_v31  ;;  %v951_v35 = vpop.f32.mrb[30].mxu1  ;;  %760 = vadd.xlane.f32.xlu0 %v721_v32  ;;  %v722_v36 = vmul.f32 %v1306_v3, %v690_v30 }
 0x206   :  { %v952_v37 = vpop.f32.mrb[31].mxu1 }
 0x207   :  { %v638_v38 = vadd.f32 %v950_v34, %v1300_v5  ;;  %v953_v39 = vadd.f32 %v952_v37, %v951_v35  ;;  %762 = vadd.xlane.f32.xlu1 %v722_v36 }
 0x209   :  { %v691_v40 = vmax.f32 %v638_v38, 0.0  ;;  %v641_v41 = vadd.f32 %v953_v39, %v1300_v5 }
 0x20b   :  { %v692_v42 = vmax.f32 %v641_v41, 0.0  ;;  %v954_v43 = vpop.f32.mrb[32].mxu1  ;;  %v723_v44 = vmul.f32 %v1306_v3, %v691_v40 }
 0x20c   :  { %v955_v45 = vpop.f32.mrb[33].mxu1 }
 0x20d   :  { %v956_v46 = vadd.f32 %v955_v45, %v954_v43  ;;  %v957_v47 = vpop.f32.mrb[34].mxu1  ;;  %764 = vadd.xlane.f32.xlu0 %v723_v44  ;;  %v724_v48 = vmul.f32 %v1306_v3, %v692_v42 }
 0x20e   :  { %v958_v49 = vpop.f32.mrb[35].mxu1 }
 0x20f   :  { %v646_v50 = vadd.f32 %v956_v46, %v1300_v5  ;;  %v959_v51 = vadd.f32 %v958_v49, %v957_v47  ;;  %766 = vadd.xlane.f32.xlu1 %v724_v48 }
 0x211   :  { %v693_v52 = vmax.f32 %v646_v50, 0.0  ;;  %v649_v53 = vadd.f32 %v959_v51, %v1300_v5 }
 0x213   :  { %v694_v54 = vmax.f32 %v649_v53, 0.0  ;;  %v960_v55 = vpop.f32.mrb[36].mxu1  ;;  %v725_v56 = vmul.f32 %v1306_v3, %v693_v52 }
 0x214   :  { %v961_v57 = vpop.f32.mrb[37].mxu1 }
 0x215   :  { %v962_v58 = vadd.f32 %v961_v57, %v960_v55  ;;  %v963_v59 = vpop.f32.mrb[38].mxu1  ;;  %768 = vadd.xlane.f32.xlu0 %v725_v56  ;;  %v726_v60 = vmul.f32 %v1306_v3, %v694_v54 }
 0x216   :  { %v964_v61 = vpop.f32.mrb[39].mxu1 }
 0x217   :  { %v654_v4 = vadd.f32 %v962_v58, %v1300_v5  ;;  %v965_v62 = vadd.f32 %v964_v61, %v963_v59  ;;  %770 = vadd.xlane.f32.xlu1 %v726_v60 }
 0x219   :  { %v695_v63 = vmax.f32 %v654_v4, 0.0  ;;  %v657_v0 = vadd.f32 %v965_v62, %v1300_v5 }
 0x21b   :  { %v696_v2 = vmax.f32 %v657_v0, 0.0  ;;  %v966_v1 = vpop.f32.mrb[40].mxu1  ;;  %v727_v6 = vmul.f32 %v1306_v3, %v695_v63 }
 0x21c   :  { %v967_v7 = vpop.f32.mrb[41].mxu1 }
 0x21d   :  { %v968_v8 = vadd.f32 %v967_v7, %v966_v1  ;;  %v969_v9 = vpop.f32.mrb[42].mxu1  ;;  %772 = vadd.xlane.f32.xlu0 %v727_v6  ;;  %v728_v10 = vmul.f32 %v1306_v3, %v696_v2 }
 0x21e   :  { %v970_v11 = vpop.f32.mrb[43].mxu1 }
 0x21f   :  { %v662_v12 = vadd.f32 %v968_v8, %v1300_v5  ;;  %v971_v13 = vadd.f32 %v970_v11, %v969_v9  ;;  %774 = vadd.xlane.f32.xlu1 %v728_v10 }
 0x221   :  { %v697_v14 = vmax.f32 %v662_v12, 0.0  ;;  %v665_v15 = vadd.f32 %v971_v13, %v1300_v5 }
 0x223   :  { %v698_v16 = vmax.f32 %v665_v15, 0.0  ;;  %v972_v17 = vpop.f32.mrb[44].mxu1  ;;  %v729_v18 = vmul.f32 %v1306_v3, %v697_v14 }
 0x224   :  { %v973_v19 = vpop.f32.mrb[45].mxu1 }
 0x225   :  { %v974_v20 = vadd.f32 %v973_v19, %v972_v17  ;;  %v975_v21 = vpop.f32.mrb[46].mxu1  ;;  %776 = vadd.xlane.f32.xlu0 %v729_v18  ;;  %v730_v22 = vmul.f32 %v1306_v3, %v698_v16 }
 0x226   :  { %v976_v23 = vpop.f32.mrb[47].mxu1 }
 0x227   :  { %v670_v24 = vadd.f32 %v974_v20, %v1300_v5  ;;  %778 = vadd.xlane.f32.xlu1 %v730_v22 }
 0x229   :  { %v699_v25 = vmax.f32 %v670_v24, 0.0 }
 0x22b   :  { %v731_v26 = vmul.f32 %v1306_v3, %v699_v25 }
 0x22d   :  { %780 = vadd.xlane.f32.xlu0 %v731_v26 }
 0x25a   :  { %v733_v28 = vpop.xlane.xlu0 %732 }
 0x25b   :  { %v789_v29 = vadd.f32 %v1357_v27, %v733_v28 }
 0x25d   :  { %815 = vst.msk [vmem:[%s1491_s7] sm:$0xff] %vm814_vm1, %v789_v29 }
 0x25e   :  { %v735_v30 = vpop.xlane.xlu0 %734 }
 0x25f   :  { %v790_v31 = vadd.f32 %v1357_v27, %v735_v30 }
 0x261   :  { %816 = vst.msk [vmem:[%s1491_s7 + $0x8] sm:$0xff] %vm814_vm1, %v790_v31 }
 0x262   :  { %v737_v5 = vpop.xlane.xlu1 %736 }
 0x263   :  { %v791_v3 = vadd.f32 %v1357_v27, %v737_v5 }
 0x265   :  { %817 = vst.msk [vmem:[%s1491_s7 + $0x10] sm:$0xff] %vm814_vm1, %v791_v3 }
 0x266   :  { %v739_v32 = vpop.xlane.xlu1 %738 }
 0x267   :  { %v792_v33 = vadd.f32 %v1357_v27, %v739_v32 }
 0x269   :  { %818 = vst.msk [vmem:[%s1491_s7 + $0x18] sm:$0xff] %vm814_vm1, %v792_v33 }
 0x26a   :  { %v741_v34 = vpop.xlane.xlu0 %740 }
 0x26b   :  { %v793_v35 = vadd.f32 %v1357_v27, %v741_v34 }
 0x26c   :  { %v743_v36 = vpop.xlane.xlu1 %742 }
 0x26d   :  { %819 = vst.msk [vmem:[%s1491_s7 + $0x20] sm:$0xff] %vm814_vm1, %v793_v35  ;;  %v794_v37 = vadd.f32 %v1357_v27, %v743_v36 }
 0x26f   :  { %820 = vst.msk [vmem:[%s1491_s7 + $0x28] sm:$0xff] %vm814_vm1, %v794_v37 }
 0x272   :  { %v745_v38 = vpop.xlane.xlu0 %744 }
 0x273   :  { %v795_v39 = vadd.f32 %v1357_v27, %v745_v38 }
 0x274   :  { %v747_v40 = vpop.xlane.xlu1 %746 }
 0x275   :  { %821 = vst.msk [vmem:[%s1491_s7 + $0x30] sm:$0xff] %vm814_vm1, %v795_v39  ;;  %v796_v41 = vadd.f32 %v1357_v27, %v747_v40 }
 0x277   :  { %822 = vst.msk [vmem:[%s1491_s7 + $0x38] sm:$0xff] %vm814_vm1, %v796_v41 }
 0x27a   :  { %v749_v42 = vpop.xlane.xlu0 %748 }
 0x27b   :  { %v797_v43 = vadd.f32 %v1357_v27, %v749_v42 }
 0x27c   :  { %v751_v44 = vpop.xlane.xlu1 %750 }
 0x27d   :  { %823 = vst.msk [vmem:[%s1491_s7 + $0x40] sm:$0xff] %vm814_vm1, %v797_v43  ;;  %v798_v45 = vadd.f32 %v1357_v27, %v751_v44 }
 0x27f   :  { %824 = vst.msk [vmem:[%s1491_s7 + $0x48] sm:$0xff] %vm814_vm1, %v798_v45 }
 0x282   :  { %v753_v46 = vpop.xlane.xlu0 %752 }
 0x283   :  { %v799_v47 = vadd.f32 %v1357_v27, %v753_v46 }
 0x284   :  { %v755_v48 = vpop.xlane.xlu1 %754 }
 0x285   :  { %825 = vst.msk [vmem:[%s1491_s7 + $0x50] sm:$0xff] %vm814_vm1, %v799_v47  ;;  %v800_v49 = vadd.f32 %v1357_v27, %v755_v48 }
 0x287   :  { %826 = vst.msk [vmem:[%s1491_s7 + $0x58] sm:$0xff] %vm814_vm1, %v800_v49 }
 0x28a   :  { %v757_v50 = vpop.xlane.xlu0 %756 }
 0x28b   :  { %v801_v51 = vadd.f32 %v1357_v27, %v757_v50 }
 0x28c   :  { %v759_v52 = vpop.xlane.xlu1 %758 }
 0x28d   :  { %827 = vst.msk [vmem:[%s1491_s7 + $0x60] sm:$0xff] %vm814_vm1, %v801_v51  ;;  %v802_v53 = vadd.f32 %v1357_v27, %v759_v52 }
 0x28f   :  { %828 = vst.msk [vmem:[%s1491_s7 + $0x68] sm:$0xff] %vm814_vm1, %v802_v53 }
 0x292   :  { %v761_v54 = vpop.xlane.xlu0 %760 }
 0x293   :  { %v803_v55 = vadd.f32 %v1357_v27, %v761_v54 }
 0x294   :  { %v763_v56 = vpop.xlane.xlu1 %762 }
 0x295   :  { %829 = vst.msk [vmem:[%s1491_s7 + $0x70] sm:$0xff] %vm814_vm1, %v803_v55  ;;  %v804_v57 = vadd.f32 %v1357_v27, %v763_v56 }
 0x297   :  { %830 = vst.msk [vmem:[%s1491_s7 + $0x78] sm:$0xff] %vm814_vm1, %v804_v57 }
 0x29a   :  { %v765_v58 = vpop.xlane.xlu0 %764 }
 0x29b   :  { %v805_v59 = vadd.f32 %v1357_v27, %v765_v58 }
 0x29c   :  { %v767_v60 = vpop.xlane.xlu1 %766 }
 0x29d   :  { %831 = vst.msk [vmem:[%s1491_s7 + $0x80] sm:$0xff] %vm814_vm1, %v805_v59  ;;  %v806_v61 = vadd.f32 %v1357_v27, %v767_v60 }
 0x29f   :  { %832 = vst.msk [vmem:[%s1491_s7 + $0x88] sm:$0xff] %vm814_vm1, %v806_v61 }
 0x2a2   :  { %v769_v4 = vpop.xlane.xlu0 %768 }
 0x2a3   :  { %v807_v62 = vadd.f32 %v1357_v27, %v769_v4 }
 0x2a4   :  { %v771_v63 = vpop.xlane.xlu1 %770 }
 0x2a5   :  { %833 = vst.msk [vmem:[%s1491_s7 + $0x90] sm:$0xff] %vm814_vm1, %v807_v62  ;;  %v808_v0 = vadd.f32 %v1357_v27, %v771_v63 }
 0x2a7   :  { %834 = vst.msk [vmem:[%s1491_s7 + $0x98] sm:$0xff] %vm814_vm1, %v808_v0 }
 0x2aa   :  { %v773_v2 = vpop.xlane.xlu0 %772 }
 0x2ab   :  { %v809_v1 = vadd.f32 %v1357_v27, %v773_v2 }
 0x2ac   :  { %v775_v6 = vpop.xlane.xlu1 %774 }
 0x2ad   :  { %835 = vst.msk [vmem:[%s1491_s7 + $0xa0] sm:$0xff] %vm814_vm1, %v809_v1  ;;  %v810_v7 = vadd.f32 %v1357_v27, %v775_v6 }
 0x2af   :  { %836 = vst.msk [vmem:[%s1491_s7 + $0xa8] sm:$0xff] %vm814_vm1, %v810_v7 }
 0x2b2   :  { %v777_v8 = vpop.xlane.xlu0 %776 }
 0x2b3   :  { %v811_v9 = vadd.f32 %v1357_v27, %v777_v8 }
 0x2b4   :  { %v779_v10 = vpop.xlane.xlu1 %778 }
 0x2b5   :  { %837 = vst.msk [vmem:[%s1491_s7 + $0xb0] sm:$0xff] %vm814_vm1, %v811_v9  ;;  %v812_v11 = vadd.f32 %v1357_v27, %v779_v10 }
 0x2b7   :  { %838 = vst.msk [vmem:[%s1491_s7 + $0xb8] sm:$0xff] %vm814_vm1, %v812_v11 }
 0x2ba   :  { %v781_v12 = vpop.xlane.xlu0 %780 }
 0x2bb   :  { %v813_v13 = vadd.f32 %v1357_v27, %v781_v12 }
 0x2bd   :  { %839 = vst.msk [vmem:[%s1491_s7 + $0xc0] sm:$0xff] %vm814_vm1, %v813_v13 }

</bundles_post_ra>
